<compile_context>
chip_gen: v7x
topology: tpu7x:2x2x1
jax: 0.10.0
libtpu: 0.0.40
codegen_flags: <defaults>
</compile_context>

<pallas_src>
import functools

import jax
import jax.numpy as jnp
from jax.experimental import pallas as pl
from jax.experimental.pallas import tpu as pltpu

INPUT_DIM = 130
HIDDEN_UNITS = [128, 64, 32]
NUM_LABELS = 5
BN_EPS = 1e-5

HEADS_PAD = 256                   # fused head output slab width (lane-dense, multiple of 128)
DEC_OFF = 0                       # [0:130)   decoder_output
CLS_OFF = DEC_OFF + INPUT_DIM     # [130:135) classification probabilities (sigmoid in-kernel)
REG_OFF = CLS_OFF + NUM_LABELS    # [135:140) regression_output
H_OFF = REG_OFF + NUM_LABELS      # [140:172) bottleneck x (identity passthrough)
assert H_OFF + HIDDEN_UNITS[2] <= HEADS_PAD


def _round_up(n, m):
    return ((n + m - 1) // m) * m


# --------------------------------------------------------------------------------------
# Kernel
# --------------------------------------------------------------------------------------
def _mmlp_kernel(x_ref, w1_ref, b1_ref, w2_ref, b2_ref, w3_ref, b3_ref,
                 wh_ref, bh_ref, out_ref):
    """One batch tile: 3 x (Linear with BN folded in + SiLU) + fused-heads matmul."""
    cd = w1_ref.dtype

    def layer(x, w_ref, b_ref):
        # BN(eval) already folded into w/b. Dropout is identity at eval time.
        y = jnp.dot(x, w_ref[...], preferred_element_type=jnp.float32) + b_ref[...]
        return y * jax.nn.sigmoid(y)          # SiLU (f32 epilogue — safe on v5e too)

    h = layer(x_ref[...].astype(cd), w1_ref, b1_ref)   # cast in-kernel (free VPU filler)
    h = layer(h.astype(cd), w2_ref, b2_ref)
    h = layer(h.astype(cd), w3_ref, b3_ref)

    # Fused heads: [dec(130) | cls(5) | reg(5) | x passthrough(32) | zero pad] -> 256 lanes.
    y = (jnp.dot(h.astype(cd), wh_ref[...], preferred_element_type=jnp.float32)
         + bh_ref[...])

    # Classification sigmoid in-kernel (EUP is a free slot); mask to the 5 cls lanes.
    col = jax.lax.broadcasted_iota(jnp.int32, (1, HEADS_PAD), 1)
    is_cls = (col >= CLS_OFF) & (col < CLS_OFF + NUM_LABELS)
    y = jnp.where(is_cls, jax.nn.sigmoid(y), y)

    out_ref[...] = y.astype(out_ref.dtype)    # bf16 store on the default path


# --------------------------------------------------------------------------------------
# Parameter init / packing
# --------------------------------------------------------------------------------------
def init_params(key, dtype=jnp.float32):
    """PyTorch-style (uniform +/- 1/sqrt(fan_in)) init; weights stored [in, out]."""
    def linear_init(key, fan_in, fan_out):
        kw, kb = jax.random.split(key)
        bound = 1.0 / jnp.sqrt(float(fan_in))
        w = jax.random.uniform(kw, (fan_in, fan_out), dtype, -bound, bound)
        b = jax.random.uniform(kb, (1, fan_out), dtype, -bound, bound)
        return w, b

    def bn_init(dim):
        return (
            jnp.ones((1, dim), dtype),   # gamma
            jnp.zeros((1, dim), dtype),  # beta
            jnp.zeros((1, dim), dtype),  # running_mean
            jnp.ones((1, dim), dtype),   # running_var
        )

    keys = jax.random.split(key, 6)
    params = {}
    params["fc1"] = linear_init(keys[0], INPUT_DIM, HIDDEN_UNITS[0])
    params["bn1"] = bn_init(HIDDEN_UNITS[0])
    params["fc2"] = linear_init(keys[1], HIDDEN_UNITS[0], HIDDEN_UNITS[1])
    params["bn2"] = bn_init(HIDDEN_UNITS[1])
    params["fc3"] = linear_init(keys[2], HIDDEN_UNITS[1], HIDDEN_UNITS[2])
    params["bn3"] = bn_init(HIDDEN_UNITS[2])
    params["fc_dec"] = linear_init(keys[3], HIDDEN_UNITS[2], INPUT_DIM)
    params["cls"] = linear_init(keys[4], HIDDEN_UNITS[2], NUM_LABELS)
    params["reg"] = linear_init(keys[5], HIDDEN_UNITS[2], NUM_LABELS)
    return params


def _fold_bn(fc, bn):
    """Fold eval-mode BatchNorm1d into the preceding Linear (exact in f32)."""
    w, b = fc
    g, be, m, v = bn
    scale = g * jax.lax.rsqrt(v.astype(jnp.float32) + BN_EPS)   # (1, out)
    return w * scale, (b - m) * scale + be


def _pack_params(params, compute_dtype):
    """BN-folded, head-fused weights; biases kept f32."""
    w1, b1 = _fold_bn(params["fc1"], params["bn1"])
    w2, b2 = _fold_bn(params["fc2"], params["bn2"])
    w3, b3 = _fold_bn(params["fc3"], params["bn3"])

    wdec, bdec = params["fc_dec"]
    wcls, bcls = params["cls"]
    wreg, breg = params["reg"]
    h3 = HIDDEN_UNITS[2]

    wh = jnp.zeros((h3, HEADS_PAD), jnp.float32)
    wh = wh.at[:, DEC_OFF:DEC_OFF + INPUT_DIM].set(wdec)
    wh = wh.at[:, CLS_OFF:CLS_OFF + NUM_LABELS].set(wcls)
    wh = wh.at[:, REG_OFF:REG_OFF + NUM_LABELS].set(wreg)
    wh = wh.at[:, H_OFF:H_OFF + h3].set(jnp.eye(h3, dtype=jnp.float32))  # bottleneck passthrough

    bh = jnp.zeros((1, HEADS_PAD), jnp.float32)
    bh = bh.at[:, DEC_OFF:DEC_OFF + INPUT_DIM].set(bdec)
    bh = bh.at[:, CLS_OFF:CLS_OFF + NUM_LABELS].set(bcls)
    bh = bh.at[:, REG_OFF:REG_OFF + NUM_LABELS].set(breg)

    cd = compute_dtype
    return (w1.astype(cd), b1.astype(jnp.float32),
            w2.astype(cd), b2.astype(jnp.float32),
            w3.astype(cd), b3.astype(jnp.float32),
            wh.astype(cd), bh.astype(jnp.float32))


def _split_heads(out, B):
    # Sigmoid is already applied in-kernel to the cls lanes; this is slicing only.
    dec = out[:B, DEC_OFF:DEC_OFF + INPUT_DIM]
    cls = out[:B, CLS_OFF:CLS_OFF + NUM_LABELS]
    reg = out[:B, REG_OFF:REG_OFF + NUM_LABELS]
    h = out[:B, H_OFF:H_OFF + HIDDEN_UNITS[2]]
    return dec, cls, reg, h


def _choose_tile(B, block_b):
    """Batch tile: ~B/4 (>=4 grid steps for pipelining / v7x megacore), multiple of 8,
    clamped to [8, block_b], with small padded-batch waste."""
    B8 = _round_up(max(B, 1), 8)
    tb = _round_up((B8 + 3) // 4, 8)
    tb = max(8, min(tb, block_b))
    Bp = _round_up(B8, tb)
    return tb, Bp


# --------------------------------------------------------------------------------------
# Wrapper
# --------------------------------------------------------------------------------------
@functools.partial(jax.jit, static_argnames=("block_b", "compute_dtype"))
def mmlp_forward(x, params, *, block_b=2048, compute_dtype=jnp.bfloat16):
    """Returns (decoder_output, classification_output, regression_output, bottleneck_x).

    compute_dtype=jnp.bfloat16 (default): bf16 weights/activations & outputs, f32
    accumulation/epilogue (~1e-2 deviation from PyTorch f32 — inference use).
    compute_dtype=jnp.float32: exact f32 math and f32 outputs.
    """
    B = x.shape[0]
    out_dtype = jnp.float32 if compute_dtype == jnp.float32 else compute_dtype

    tb, Bp = _choose_tile(B, block_b)
    grid = (Bp // tb,)

    flat = _pack_params(params, compute_dtype)

    # Row padding only (no lane padding, no dtype cast in XLA); usually a no-op.
    xp = x if Bp == B else jnp.pad(x, ((0, Bp - B), (0, 0)))

    def row_spec(f):
        return pl.BlockSpec((tb, f), lambda i: (i, 0))

    def const_spec(shape):
        # Weights/biases: constant block index => DMA'd once, VMEM-resident across tiles.
        return pl.BlockSpec(shape, lambda i: (0, 0))

    in_specs = [
        row_spec(INPUT_DIM),                                                      # x (B,130)
        const_spec((INPUT_DIM, HIDDEN_UNITS[0])), const_spec((1, HIDDEN_UNITS[0])),
        const_spec((HIDDEN_UNITS[0], HIDDEN_UNITS[1])), const_spec((1, HIDDEN_UNITS[1])),
        const_spec((HIDDEN_UNITS[1], HIDDEN_UNITS[2])), const_spec((1, HIDDEN_UNITS[2])),
        const_spec((HIDDEN_UNITS[2], HEADS_PAD)), const_spec((1, HEADS_PAD)),     # fused heads
    ]

    out = pl.pallas_call(
        _mmlp_kernel,
        out_shape=jax.ShapeDtypeStruct((Bp, HEADS_PAD), out_dtype),
        grid=grid,
        in_specs=in_specs,
        out_specs=row_spec(HEADS_PAD),
        compiler_params=pltpu.CompilerParams(
            dimension_semantics=("parallel",),   # v7x megacore: split batch tiles across TCs
        ),
    )(xp, *flat)

    return _split_heads(out, B)


# --------------------------------------------------------------------------------------
# References for correctness checking
# --------------------------------------------------------------------------------------
def mmlp_reference(x, params):
    """Pure-f32, unfused reference matching the PyTorch eval-mode forward."""
    hp = jax.lax.Precision.HIGHEST

    def block(x, fc, bn):
        w, b = fc
        g, be, m, v = bn
        y = jnp.dot(x, w, precision=hp) + b
        y = (y - m) / jnp.sqrt(v + BN_EPS) * g + be
        return y * jax.nn.sigmoid(y)

    h = block(x, params["fc1"], params["bn1"])
    h = block(h, params["fc2"], params["bn2"])
    h = block(h, params["fc3"], params["bn3"])
    dec = jnp.dot(h, params["fc_dec"][0], precision=hp) + params["fc_dec"][1]
    cls = jax.nn.sigmoid(jnp.dot(h, params["cls"][0], precision=hp) + params["cls"][1])
    reg = jnp.dot(h, params["reg"][0], precision=hp) + params["reg"][1]
    return dec, cls, reg, h


def mmlp_reference_matched(x, params, compute_dtype):
    """Plain-JAX mirror of the kernel's folded / fused / cast numerics."""
    B = x.shape[0]
    w1, b1, w2, b2, w3, b3, wh, bh = _pack_params(params, compute_dtype)
    out_dtype = jnp.float32 if compute_dtype == jnp.float32 else compute_dtype

    def layer(a, w, b):
        y = jnp.dot(a.astype(w.dtype), w, preferred_element_type=jnp.float32) + b
        return y * jax.nn.sigmoid(y)

    h = layer(x, w1, b1)
    h = layer(h, w2, b2)
    h = layer(h, w3, b3)
    y = jnp.dot(h.astype(wh.dtype), wh, preferred_element_type=jnp.float32) + bh
    y = y.at[:, CLS_OFF:CLS_OFF + NUM_LABELS].set(
        jax.nn.sigmoid(y[:, CLS_OFF:CLS_OFF + NUM_LABELS]))
    return _split_heads(y.astype(out_dtype), B)


def _max_abs_err(a, b):
    return float(jnp.max(jnp.abs(a.astype(jnp.float32) - b.astype(jnp.float32))))


# --------------------------------------------------------------------------------------
if __name__ == "__main__":
    key = jax.random.PRNGKey(0)
    k_params, k_x1, k_x2 = jax.random.split(key, 3)

    params = init_params(k_params)

    # Small deterministic inputs; second batch size exercises the row-pad / grid path.
    x_small = jax.random.normal(k_x1, (8, INPUT_DIM), jnp.float32)
    x_odd = jax.random.normal(k_x2, (20, INPUT_DIM), jnp.float32)

    # Default fast path: bf16 weights/activations, f32 accumulation, bf16 outputs.
    outs_bf16 = mmlp_forward(x_small, params)
    jax.block_until_ready(outs_bf16)

    outs_bf16_odd = mmlp_forward(x_odd, params)
    jax.block_until_ready(outs_bf16_odd)

    # Exact f32-compute path (same kernel, compute_dtype=f32, f32 outputs).
    outs_f32 = mmlp_forward(x_small, params, compute_dtype=jnp.float32)
    jax.block_until_ready(outs_f32)

    ref_exact = mmlp_reference(x_small, params)
    ref_matched = mmlp_reference_matched(x_small, params, jnp.bfloat16)
    ref_matched_odd = mmlp_reference_matched(x_odd, params, jnp.bfloat16)

    # f32 kernel vs exact reference: BN folding / head fusion are exact math; the bound
    # only covers MXU f32 pass decomposition vs XLA HIGHEST-precision dot ordering.
    for got, want in zip(outs_f32, ref_exact):
        assert got.shape == want.shape
        err = _max_abs_err(got, want)
        assert err < 1e-3, f"f32 path mismatch: {err}"

    # bf16 kernel vs numerics-matched bf16 reference (bf16 storage rounding included).
    for got, want in zip(outs_bf16, ref_matched):
        assert got.shape == want.shape
        err = _max_abs_err(got, want)
        assert err < 2e-2, f"bf16 path mismatch: {err}"

    for got, want in zip(outs_bf16_odd, ref_matched_odd):
        assert got.shape == want.shape
        err = _max_abs_err(got, want)
        assert err < 2e-2, f"bf16 (padded batch) path mismatch: {err}"

    print("KERNEL_OK")
</pallas_src>

<mosaic_0001>
module attributes {stable_mosaic.version = 11 : i64} {
  func.func @_mmlp_kernel(%arg0: i32, %arg1: memref<8x130xf32, #tpu.memory_space<vmem>>, %arg2: memref<130x128xbf16, #tpu.memory_space<vmem>>, %arg3: memref<1x128xf32, #tpu.memory_space<vmem>>, %arg4: memref<128x64xbf16, #tpu.memory_space<vmem>>, %arg5: memref<1x64xf32, #tpu.memory_space<vmem>>, %arg6: memref<64x32xbf16, #tpu.memory_space<vmem>>, %arg7: memref<1x32xf32, #tpu.memory_space<vmem>>, %arg8: memref<32x256xbf16, #tpu.memory_space<vmem>>, %arg9: memref<1x256xf32, #tpu.memory_space<vmem>>, %arg10: memref<8x256xbf16, #tpu.memory_space<vmem>>) attributes {dimension_semantics = [#tpu.dimension_semantics<parallel>], iteration_bounds = array<i64: 1>, scalar_prefetch = 0 : i64, scratch_operands = 0 : i64, tpu.core_type = #tpu.core_type<tc>, window_params = [{transform_indices = @transform_0, window_bounds = array<i64: 8, 130>}, {pipeline_mode = #tpu.pipeline_mode<synchronous>, transform_indices = @transform_1, window_bounds = array<i64: 130, 128>}, {pipeline_mode = #tpu.pipeline_mode<synchronous>, transform_indices = @transform_2, window_bounds = array<i64: 1, 128>}, {pipeline_mode = #tpu.pipeline_mode<synchronous>, transform_indices = @transform_3, window_bounds = array<i64: 128, 64>}, {pipeline_mode = #tpu.pipeline_mode<synchronous>, transform_indices = @transform_4, window_bounds = array<i64: 1, 64>}, {pipeline_mode = #tpu.pipeline_mode<synchronous>, transform_indices = @transform_5, window_bounds = array<i64: 64, 32>}, {pipeline_mode = #tpu.pipeline_mode<synchronous>, transform_indices = @transform_6, window_bounds = array<i64: 1, 32>}, {pipeline_mode = #tpu.pipeline_mode<synchronous>, transform_indices = @transform_7, window_bounds = array<i64: 32, 256>}, {pipeline_mode = #tpu.pipeline_mode<synchronous>, transform_indices = @transform_8, window_bounds = array<i64: 1, 256>}, {transform_indices = @transform_9, window_bounds = array<i64: 8, 256>}]} {
    %c0 = arith.constant 0 : index
    %c0_0 = arith.constant 0 : index
    %0 = vector.load %arg1[%c0, %c0_0] : memref<8x130xf32, #tpu.memory_space<vmem>>, vector<8x130xf32>
    %1 = arith.truncf %0 : vector<8x130xf32> to vector<8x130xbf16>
    %c0_1 = arith.constant 0 : index
    %c0_2 = arith.constant 0 : index
    %2 = vector.load %arg2[%c0_1, %c0_2] : memref<130x128xbf16, #tpu.memory_space<vmem>>, vector<130x128xbf16>
    %cst = arith.constant dense<0.000000e+00> : vector<8x128xf32>
    %3 = tpu.matmul %1, %2, %cst {dimension_numbers = #tpu.dot_dimension_numbers<[1], [0], [0], [1], [0, 0, 1, 1], [], []>} : vector<8x130xbf16>, vector<130x128xbf16>, vector<8x128xf32> -> vector<8x128xf32>
    %c0_3 = arith.constant 0 : index
    %c0_4 = arith.constant 0 : index
    %4 = vector.load %arg3[%c0_3, %c0_4] : memref<1x128xf32, #tpu.memory_space<vmem>>, vector<1x128xf32>
    %5 = vector.broadcast %4 : vector<1x128xf32> to vector<8x128xf32>
    %6 = arith.addf %3, %5 : vector<8x128xf32>
    %7 = arith.negf %6 : vector<8x128xf32>
    %8 = math.exp %7 : vector<8x128xf32>
    %cst_5 = arith.constant 1.000000e+00 : f32
    %9 = vector.broadcast %cst_5 : f32 to vector<8x128xf32>
    %10 = arith.addf %9, %8 : vector<8x128xf32>
    %11 = arith.divf %9, %10 : vector<8x128xf32>
    %12 = arith.mulf %6, %11 : vector<8x128xf32>
    %13 = arith.truncf %12 : vector<8x128xf32> to vector<8x128xbf16>
    %c0_6 = arith.constant 0 : index
    %c0_7 = arith.constant 0 : index
    %14 = vector.load %arg4[%c0_6, %c0_7] : memref<128x64xbf16, #tpu.memory_space<vmem>>, vector<128x64xbf16>
    %cst_8 = arith.constant dense<0.000000e+00> : vector<8x64xf32>
    %15 = tpu.matmul %13, %14, %cst_8 {dimension_numbers = #tpu.dot_dimension_numbers<[1], [0], [0], [1], [0, 0, 1, 1], [], []>} : vector<8x128xbf16>, vector<128x64xbf16>, vector<8x64xf32> -> vector<8x64xf32>
    %c0_9 = arith.constant 0 : index
    %c0_10 = arith.constant 0 : index
    %16 = vector.load %arg5[%c0_9, %c0_10] : memref<1x64xf32, #tpu.memory_space<vmem>>, vector<1x64xf32>
    %17 = vector.broadcast %16 : vector<1x64xf32> to vector<8x64xf32>
    %18 = arith.addf %15, %17 : vector<8x64xf32>
    %19 = arith.negf %18 : vector<8x64xf32>
    %20 = math.exp %19 : vector<8x64xf32>
    %cst_11 = arith.constant 1.000000e+00 : f32
    %21 = vector.broadcast %cst_11 : f32 to vector<8x64xf32>
    %22 = arith.addf %21, %20 : vector<8x64xf32>
    %23 = arith.divf %21, %22 : vector<8x64xf32>
    %24 = arith.mulf %18, %23 : vector<8x64xf32>
    %25 = arith.truncf %24 : vector<8x64xf32> to vector<8x64xbf16>
    %c0_12 = arith.constant 0 : index
    %c0_13 = arith.constant 0 : index
    %26 = vector.load %arg6[%c0_12, %c0_13] : memref<64x32xbf16, #tpu.memory_space<vmem>>, vector<64x32xbf16>
    %cst_14 = arith.constant dense<0.000000e+00> : vector<8x32xf32>
    %27 = tpu.matmul %25, %26, %cst_14 {dimension_numbers = #tpu.dot_dimension_numbers<[1], [0], [0], [1], [0, 0, 1, 1], [], []>} : vector<8x64xbf16>, vector<64x32xbf16>, vector<8x32xf32> -> vector<8x32xf32>
    %c0_15 = arith.constant 0 : index
    %c0_16 = arith.constant 0 : index
    %28 = vector.load %arg7[%c0_15, %c0_16] : memref<1x32xf32, #tpu.memory_space<vmem>>, vector<1x32xf32>
    %29 = vector.broadcast %28 : vector<1x32xf32> to vector<8x32xf32>
    %30 = arith.addf %27, %29 : vector<8x32xf32>
    %31 = arith.negf %30 : vector<8x32xf32>
    %32 = math.exp %31 : vector<8x32xf32>
    %cst_17 = arith.constant 1.000000e+00 : f32
    %33 = vector.broadcast %cst_17 : f32 to vector<8x32xf32>
    %34 = arith.addf %33, %32 : vector<8x32xf32>
    %35 = arith.divf %33, %34 : vector<8x32xf32>
    %36 = arith.mulf %30, %35 : vector<8x32xf32>
    %37 = arith.truncf %36 : vector<8x32xf32> to vector<8x32xbf16>
    %c0_18 = arith.constant 0 : index
    %c0_19 = arith.constant 0 : index
    %38 = vector.load %arg8[%c0_18, %c0_19] : memref<32x256xbf16, #tpu.memory_space<vmem>>, vector<32x256xbf16>
    %cst_20 = arith.constant dense<0.000000e+00> : vector<8x256xf32>
    %39 = tpu.matmul %37, %38, %cst_20 {dimension_numbers = #tpu.dot_dimension_numbers<[1], [0], [0], [1], [0, 0, 1, 1], [], []>} : vector<8x32xbf16>, vector<32x256xbf16>, vector<8x256xf32> -> vector<8x256xf32>
    %c0_21 = arith.constant 0 : index
    %c0_22 = arith.constant 0 : index
    %40 = vector.load %arg9[%c0_21, %c0_22] : memref<1x256xf32, #tpu.memory_space<vmem>>, vector<1x256xf32>
    %41 = vector.broadcast %40 : vector<1x256xf32> to vector<8x256xf32>
    %42 = arith.addf %39, %41 : vector<8x256xf32>
    %43 = tpu.iota {dimensions = array<i32: 1>} : vector<1x256xi32>
    %c130_i32 = arith.constant 130 : i32
    %44 = vector.broadcast %c130_i32 : i32 to vector<1x256xi32>
    %45 = arith.cmpi sge, %43, %44 : vector<1x256xi32>
    %c135_i32 = arith.constant 135 : i32
    %46 = vector.broadcast %c135_i32 : i32 to vector<1x256xi32>
    %47 = arith.cmpi slt, %43, %46 : vector<1x256xi32>
    %48 = arith.andi %45, %47 : vector<1x256xi1>
    %49 = arith.negf %42 : vector<8x256xf32>
    %50 = math.exp %49 : vector<8x256xf32>
    %cst_23 = arith.constant 1.000000e+00 : f32
    %51 = vector.broadcast %cst_23 : f32 to vector<8x256xf32>
    %52 = arith.addf %51, %50 : vector<8x256xf32>
    %53 = arith.divf %51, %52 : vector<8x256xf32>
    %54 = vector.shape_cast %48 : vector<1x256xi1> to vector<1x256xi1>
    %55 = vector.broadcast %54 : vector<1x256xi1> to vector<8x256xi1>
    %56 = arith.select %55, %53, %42 : vector<8x256xi1>, vector<8x256xf32>
    %57 = arith.truncf %56 : vector<8x256xf32> to vector<8x256xbf16>
    %c0_24 = arith.constant 0 : index
    %c0_25 = arith.constant 0 : index
    %58 = vector.load %arg10[%c0_24, %c0_25] : memref<8x256xbf16, #tpu.memory_space<vmem>>, vector<8x256xbf16>
    tpu.vector_store %arg10[%c0_24, %c0_25], %57 {strides = array<i32>} : memref<8x256xbf16, #tpu.memory_space<vmem>>, vector<8x256xbf16>,
    return
  }
  func.func @transform_0(%arg0: i32) -> (i32, i32) {
    %c0_i32 = arith.constant 0 : i32
    %c0_i32_0 = arith.constant 0 : i32
    return %arg0, %c0_i32 : i32, i32
  }
  func.func @transform_1(%arg0: i32) -> (i32, i32) {
    %c0_i32 = arith.constant 0 : i32
    %c0_i32_0 = arith.constant 0 : i32
    %c0_i32_1 = arith.constant 0 : i32
    return %c0_i32, %c0_i32_0 : i32, i32
  }
  func.func @transform_2(%arg0: i32) -> (i32, i32) {
    %c0_i32 = arith.constant 0 : i32
    %c0_i32_0 = arith.constant 0 : i32
    %c0_i32_1 = arith.constant 0 : i32
    return %c0_i32, %c0_i32_0 : i32, i32
  }
  func.func @transform_3(%arg0: i32) -> (i32, i32) {
    %c0_i32 = arith.constant 0 : i32
    %c0_i32_0 = arith.constant 0 : i32
    %c0_i32_1 = arith.constant 0 : i32
    return %c0_i32, %c0_i32_0 : i32, i32
  }
  func.func @transform_4(%arg0: i32) -> (i32, i32) {
    %c0_i32 = arith.constant 0 : i32
    %c0_i32_0 = arith.constant 0 : i32
    %c0_i32_1 = arith.constant 0 : i32
    return %c0_i32, %c0_i32_0 : i32, i32
  }
  func.func @transform_5(%arg0: i32) -> (i32, i32) {
    %c0_i32 = arith.constant 0 : i32
    %c0_i32_0 = arith.constant 0 : i32
    %c0_i32_1 = arith.constant 0 : i32
    return %c0_i32, %c0_i32_0 : i32, i32
  }
  func.func @transform_6(%arg0: i32) -> (i32, i32) {
    %c0_i32 = arith.constant 0 : i32
    %c0_i32_0 = arith.constant 0 : i32
    %c0_i32_1 = arith.constant 0 : i32
    return %c0_i32, %c0_i32_0 : i32, i32
  }
  func.func @transform_7(%arg0: i32) -> (i32, i32) {
    %c0_i32 = arith.constant 0 : i32
    %c0_i32_0 = arith.constant 0 : i32
    %c0_i32_1 = arith.constant 0 : i32
    return %c0_i32, %c0_i32_0 : i32, i32
  }
  func.func @transform_8(%arg0: i32) -> (i32, i32) {
    %c0_i32 = arith.constant 0 : i32
    %c0_i32_0 = arith.constant 0 : i32
    %c0_i32_1 = arith.constant 0 : i32
    return %c0_i32, %c0_i32_0 : i32, i32
  }
  func.func @transform_9(%arg0: i32) -> (i32, i32) {
    %c0_i32 = arith.constant 0 : i32
    %c0_i32_0 = arith.constant 0 : i32
    return %arg0, %c0_i32 : i32, i32
  }
}

</mosaic_0001>

<bundles_post_ra>
// kernel: mmlp_forward.1
= control target key start
LH: loop header
LB: loop body
LE: loop exit
PB: predicated region body
PF: predicated region fallthrough
CT: control target
= control target key end

     0   :  { %v629_v0 = vmov 0   ;;  %vm112_vm0 = vcmask 15360   ;;  %vm116_vm1 = vcmask 1040384   ;;  %v630_v16 = vmov 0.0   ;;  %s780_s1 = inlined_call_operand.vmem [shape: bf16[130,128], index: 1, kind: input, shape index: {}]   ;;  %s781_s0 = inlined_call_operand.vmem [shape: f32[8,130], index: 0, kind: input, shape index: {}]   ;;  %s782_s3 = inlined_call_operand.vmem [shape: bf16[128,64], index: 3, kind: input, shape index: {}]   ;;  %s783_s2 = inlined_call_operand.vmem [shape: f32[1,128], index: 2, kind: input, shape index: {}]   ;;  %s784_s5 = inlined_call_operand.vmem [shape: bf16[64,32], index: 5, kind: input, shape index: {}]   ;;  %s785_s4 = inlined_call_operand.vmem [shape: f32[1,64], index: 4, kind: input, shape index: {}]   ;;  %s786_s7 = inlined_call_operand.vmem [shape: bf16[32,256], index: 7, kind: input, shape index: {}]   ;;  %s787_s6 = inlined_call_operand.vmem [shape: f32[1,32], index: 6, kind: input, shape index: {}]   ;;  %s788_s8 = inlined_call_operand.vmem [shape: f32[1,256], index: 8, kind: input, shape index: {}]   ;;  %s789_s9 = inlined_call_operand.vmem [shape: bf16[8,256], index: 9, kind: output, shape index: {}]  }
   0x1   :  { %120 = vmatprep.subr.bf16.mxu0 %v629_v0  ;;  %v586_v1 = vld [vmem:[%s780_s1] sm:$0xff]   ;;  %v587_v2 = vld [vmem:[%s780_s1 + $0x8] sm:$0xff]   ;;  %v588_v3 = vld [vmem:[%s780_s1 + $0x10] sm:$0xff]   ;;  %551 = vmatprep.subr.bf16.mxu1 %v630_v16  ;;  %vm631_vm2 = vmmov 0   ;;  %vm326_vm3 = vcmask 523264   ;;  %vm414_vm4 = vcmask 261120  }
   0x2   :  { %121 = vmatpush1.bf16.msra.mxu0 %v586_v1  ;;  %v34_v4 = vld [vmem:[%s781_s0 + $0x8] sm:$0xff]  ;;  %v589_v5 = vld [vmem:[%s780_s1 + $0x18] sm:$0xff]   ;;  %v590_v7 = vld [vmem:[%s780_s1 + $0x20] sm:$0xff]   ;;  %567 = vmatprep.mubr.msk.bf16.mxu1 %vm631_vm2, %v630_v16 }
   0x3   :  { %122 = vmatprep.subr.bf16.mxu0 %v629_v0  ;;  %v36_v6 = vpack.c.bf16 %v34_v4, %v34_v4  ;;  %v591_v8 = vld [vmem:[%s780_s1 + $0x28] sm:$0xff]   ;;  %v592_v9 = vld [vmem:[%s780_s1 + $0x30] sm:$0xff]   ;;  %v593_v10 = vld [vmem:[%s780_s1 + $0x38] sm:$0xff]   ;;  %v384_v4 = vlaneseq }
   0x4   :  { %v594_v11 = vld [vmem:[%s780_s1 + $0x40] ss:$0 sps:$4 sm:$0x11]   ;;  %v596_v17 = vld [vmem:[%s782_s3 + $0x8] sm:$0xff]   ;;  %v597_v18 = vld [vmem:[%s782_s3 + $0x10] sm:$0xff]  }
   0x5   :  { %509 = vmatprep.mubr.msk.bf16.mxu0 %vm112_vm0, %v36_v6  ;;  %v33_v12 = vld [vmem:[%s781_s0] sm:$0xff]  ;;  %v118_v13 = vsel %vm116_vm1, %v594_v11, 0  ;;  %v598_v19 = vld [vmem:[%s782_s3 + $0x18] sm:$0xff]   ;;  %v600_v21 = vld [vmem:[%s782_s3 + $0x28] sm:$0xff]  }
   0x6   :  { %123 = vmatpush1.bf16.msra.mxu0 %v587_v2  ;;  %v35_v14 = vpack.c.bf16 %v33_v12, %v33_v12  ;;  %v595_v15 = vld [vmem:[%s782_s3] sm:$0xff]   ;;  %v601_v22 = vld [vmem:[%s782_s3 + $0x30] sm:$0xff]   ;;  %v602_v23 = vld [vmem:[%s782_s3 + $0x38] sm:$0xff]  }
   0x7   :  { %124 = vmatprep.subr.bf16.mxu0 %v629_v0  ;;  %552 = vmatpush3.bf16.msra.mxu1 %v595_v15  ;;  %v599_v20 = vld [vmem:[%s782_s3 + $0x20] sm:$0xff]   ;;  %v604_v37 = vld [vmem:[%s784_s5 + $0x8] sm:$0xff]   ;;  %v605_v38 = vld [vmem:[%s784_s5 + $0x10] sm:$0xff]  }
   0x8   :  { %553 = vmatprep.subr.bf16.mxu1 %v630_v16  ;;  %v499_v24 = vld [vmem:[%s783_s2] ss:$0 sm:$0xff]  ;;  %v606_v39 = vld [vmem:[%s784_s5 + $0x18] sm:$0xff]   ;;  %v609_v52 = vld [vmem:[%s786_s7 + $0x4] ss:$8 sps:$4 sm:$0xff]  }
   0x9   :  { %v603_v36 = vld [vmem:[%s784_s5] sm:$0xff]   ;;  %v612_v54 = vld [vmem:[%s786_s7 + $0x14] ss:$8 sps:$4 sm:$0xff]   ;;  %v610_v55 = vld [vmem:[%s786_s7 + $0x10] ss:$8 sps:$4 sm:$0xff]  }
   0xa   :  { %125 = vmatpush1.bf16.msra.mxu0 %v588_v3  ;;  %v511_v40 = vld [vmem:[%s785_s4] ss:$0 sm:$0xff] }
   0xb   :  { %126 = vmatprep.subr.bf16.mxu0 %v629_v0  ;;  %554 = vmatpush3.bf16.msra.mxu1 %v596_v17  ;;  %v607_v53 = vld [vmem:[%s786_s7] ss:$8 sps:$4 sm:$0xff]  }
   0xc   :  { %555 = vmatprep.subr.bf16.mxu1 %v630_v16  ;;  %v521_v56 = vld [vmem:[%s787_s6] ss:$0 sm:$0xff] }
   0xe   :  { %127 = vmatpush1.bf16.msra.mxu0 %v589_v5  ;;  %v385_v5 = vshrl.u32 %v384_v4, 7 }
   0xf   :  { %128 = vmatprep.subr.bf16.mxu0 %v629_v0  ;;  %556 = vmatpush3.bf16.msra.mxu1 %v597_v18 }
  0x10   :  { %557 = vmatprep.subr.bf16.mxu1 %v630_v16  ;;  %v390_v6 = vsub.s32 1, %v385_v5 }
  0x12   :  { %129 = vmatpush1.bf16.msra.mxu0 %v590_v7  ;;  %v382_v7 = vld [vmem:[%s788_s8] sm:$0x3] }
  0x13   :  { %130 = vmatprep.subr.bf16.mxu0 %v629_v0  ;;  %558 = vmatpush3.bf16.msra.mxu1 %v598_v19  ;;  %v386_v19 = vsub.s32 0, %v385_v5 }
  0x14   :  { %559 = vmatprep.subr.bf16.mxu1 %v630_v16 }
  0x16   :  { %131 = vmatpush1.bf16.msra.mxu0 %v591_v8  ;;  %v391_v8 = vrot.slane %v382_v7, %v390_v6 }
  0x17   :  { %132 = vmatprep.subr.bf16.mxu0 %v629_v0  ;;  %560 = vmatpush3.bf16.msra.mxu1 %v599_v20  ;;  %v387_v20 = vrot.slane %v382_v7, %v386_v19 }
  0x18   :  { %561 = vmatprep.subr.bf16.mxu1 %v630_v16 }
  0x1a   :  { %133 = vmatpush1.bf16.msra.mxu0 %v592_v9 }
  0x1b   :  { %134 = vmatprep.subr.bf16.mxu0 %v629_v0  ;;  %562 = vmatpush3.bf16.msra.mxu1 %v600_v21 }
  0x1c   :  { %563 = vmatprep.subr.bf16.mxu1 %v630_v16 }
  0x1e   :  { %135 = vmatpush1.bf16.msra.mxu0 %v593_v10 }
  0x1f   :  { %136 = vmatprep.subr.bf16.mxu0 %v629_v0  ;;  %564 = vmatpush3.bf16.msra.mxu1 %v601_v22 }
  0x20   :  { %565 = vmatprep.subr.bf16.mxu1 %v630_v16 }
  0x22   :  { %137 = vmatpush1.bf16.msra.mxu0 %v118_v13 }
  0x23   :  { %566 = vmatpush3.bf16.msra.mxu1 %v602_v23  ;;  %418 = vmatprep.subr.bf16.mxu0 %v609_v52 }
  0x24   :  { %571 = vmatprep.subr.bf16.mxu1 %v630_v16 }
  0x25   :  { %153 = vmatmul.mubr.bf16.vlgmr.msra.gmra.mrb[0].mxu0 %v35_v14 }
  0x26   :  { %450 = vmatprep.mubr.bf16.mxu0 %v629_v0  ;;  %419 = vmatpush1.bf16.msra.mxu0 %v607_v53 }
  0x27   :  { %420 = vmatprep.subr.bf16.mxu0 %v612_v54 }
  0x2a   :  { %421 = vmatpush1.bf16.msra.mxu0 %v610_v55 }
  0xf8   :  { %v154_v25 = vpop.f32.mrb[0].mxu0 }
  0xf9   :  { %v155_v26 = vadd.f32 %v499_v24, %v154_v25  ;;  %v156_v27 = vpop.f32.mrb[1].mxu0 }
  0xfa   :  { %v157_v28 = vpop.f32.mrb[2].mxu0 }
  0xfb   :  { %v510_v29 = vmul.f32 -1.442695, %v155_v26  ;;  %v158_v30 = vpop.f32.mrb[3].mxu0 }
  0xfd   :  { %613 = vpow2.f32 %v510_v29 }
 0x107   :  { %v614_v31 = vpop.eup %613 }
 0x108   :  { %v163_v32 = vadd.f32 1.0, %v614_v31 }
 0x10a   :  { %615 = vrcp.f32 %v163_v32 }
 0x114   :  { %v616_v33 = vpop.eup %615 }
 0x115   :  { %v166_v34 = vmul.f32 %v616_v33, %v155_v26 }
 0x117   :  { %v167_v35 = vpack.c.bf16 %v166_v34, %v166_v34 }
 0x119   :  { %568 = vmatmul.mubr.bf16.vlgmr.msra.gmra.mrb[0].mxu1 %v167_v35 }
 0x11a   :  { %579 = vmatprep.mubr.msk.bf16.mxu1 %vm631_vm2, %v630_v16  ;;  %572 = vmatpush3.bf16.msra.mxu1 %v603_v36 }
 0x11b   :  { %573 = vmatprep.subr.bf16.mxu1 %v630_v16 }
 0x11e   :  { %574 = vmatpush3.bf16.msra.mxu1 %v604_v37 }
 0x11f   :  { %575 = vmatprep.subr.bf16.mxu1 %v630_v16 }
 0x122   :  { %576 = vmatpush3.bf16.msra.mxu1 %v605_v38 }
 0x123   :  { %577 = vmatprep.subr.bf16.mxu1 %v630_v16  ;;  %v460_v16 = vand.u32 127, %v384_v4 }
 0x125   :  { %v461_v18 = vadd.s32 128, %v460_v16 }
 0x126   :  { %578 = vmatpush3.bf16.msra.mxu1 %v606_v39 }
 0x127   :  { %vm463_vm5 = vcmp.ge.s32.totalorder %v461_v18, 130  ;;  %vm465_vm6 = vcmp.lt.s32.totalorder %v461_v18, 135 }
 0x128   :  { %vm467_vm7 = vmand %vm463_vm5, %vm465_vm6 }
 0x1ec   :  { %v273_v41 = vpop.f32.mrb[0].mxu1 }
 0x1ed   :  { %v274_v42 = vadd.f32 %v511_v40, %v273_v41  ;;  %v569_v43 = vpop.f32.mrb[1].mxu1 }
 0x1ee   :  { %v276_v44 = vpop.f32.mrb[2].mxu1 }
 0x1ef   :  { %v520_v45 = vmul.f32 -1.442695, %v274_v42  ;;  %v570_v46 = vpop.f32.mrb[3].mxu1 }
 0x1f1   :  { %617 = vpow2.f32 %v520_v45 }
 0x1fb   :  { %v618_v47 = vpop.eup %617 }
 0x1fc   :  { %v282_v48 = vadd.f32 1.0, %v618_v47 }
 0x1fe   :  { %619 = vrcp.f32 %v282_v48 }
 0x208   :  { %v620_v49 = vpop.eup %619 }
 0x209   :  { %v285_v50 = vmul.f32 %v620_v49, %v274_v42 }
 0x20b   :  { %v286_v51 = vpack.c.bf16 %v285_v50, %v285_v50 }
 0x20d   :  { %580 = vmatmul.mubr.msk.bf16.vlgmr.msra.gmra.mrb[4].mxu1 %vm326_vm3, %v286_v51 }
 0x2e0   :  { %v364_v57 = vpop.f32.mrb[4].mxu1 }
 0x2e1   :  { %v365_v58 = vadd.f32 %v521_v56, %v364_v57  ;;  %v581_v59 = vpop.f32.mrb[5].mxu1 }
 0x2e2   :  { %v367_v60 = vpop.f32.mrb[6].mxu1 }
 0x2e3   :  { %v527_v61 = vmul.f32 -1.442695, %v365_v58  ;;  %v582_v62 = vpop.f32.mrb[7].mxu1 }
 0x2e5   :  { %621 = vpow2.f32 %v527_v61 }
 0x2ef   :  { %v622_v63 = vpop.eup %621 }
 0x2f0   :  { %v373_v0 = vadd.f32 1.0, %v622_v63 }
 0x2f2   :  { %623 = vrcp.f32 %v373_v0 }
 0x2fc   :  { %v624_v1 = vpop.eup %623 }
 0x2fd   :  { %v376_v2 = vmul.f32 %v624_v1, %v365_v58 }
 0x2ff   :  { %v377_v3 = vpack.c.bf16 %v376_v2, %v376_v2 }
 0x301   :  { %532 = vmatmul.mubr.msk.bf16.vlgmr.msra.gmra.mrb[4].mxu0 %vm414_vm4, %v377_v3 }
 0x3d4   :  { %v452_v9 = vpop.f32.mrb[4].mxu0 }
 0x3d5   :  { %v454_v10 = vpop.f32.mrb[5].mxu0  ;;  %v453_v22 = vadd.f32 %v452_v9, %v387_v20 }
 0x3d6   :  { %v455_v11 = vadd.f32 %v454_v10, %v391_v8  ;;  %v456_v12 = vpop.f32.mrb[6].mxu0 }
 0x3d7   :  { %v457_v13 = vpop.f32.mrb[7].mxu0 }
 0x3d8   :  { %v534_v14 = vmul.f32 -1.442695, %v455_v11 }
 0x3da   :  { %625 = vpow2.f32 %v534_v14 }
 0x3e4   :  { %v626_v15 = vpop.eup %625 }
 0x3e5   :  { %v475_v17 = vadd.f32 1.0, %v626_v15 }
 0x3e7   :  { %627 = vrcp.f32 %v475_v17 }
 0x3f1   :  { %v628_v21 = vpop.eup %627 }
 0x3f2   :  { %v485_v23 = vsel %vm467_vm7, %v628_v21, %v455_v11 }
 0x3f3   :  { %v536_v24 = vpack.c.bf16 %v485_v23, %v453_v22 }
 0x3f5   :  { %494 = vst [vmem:[%s789_s9] sm:$0xff] %v536_v24 }

</bundles_post_ra>
